<compile_context>
chip_gen: v6e
topology: v6e:2x2x1
jax: 0.10.0
libtpu: 0.0.40
codegen_flags: <defaults>
</compile_context>

<pallas_src>
import jax
import jax.numpy as jnp
from jax.experimental import pallas as pl
from jax.experimental.pallas import tpu as pltpu


def _conv3x3_silu_kernel(x_ref, w_ref, b_ref, o_ref):
    # x_ref: (Bt, H, W) VMEM   unpadded input planes for this batch tile
    # w_ref: (3, 3)  SMEM      conv kernel (read as scalars)
    # b_ref: (1,)    SMEM      conv bias
    # o_ref: (Bt, H, W) VMEM
    x = x_ref[...].astype(jnp.float32)
    Bt, H, W = x.shape

    # Row-shifted planes (sublane axis only), zeros shifted in at the borders (== padding=1).
    zrow = jnp.zeros((Bt, 1, W), jnp.float32)
    x_up = jnp.concatenate([zrow, x[:, : H - 1, :]], axis=1)   # x_up[i] = x[i-1]
    x_dn = jnp.concatenate([x[:, 1:, :], zrow], axis=1)        # x_dn[i] = x[i+1]

    # Column bands: band_c[i, j] = sum_r w[r, c] * x[i + r - 1, j]  (no lane shifts yet).
    bands = []
    for c in range(3):
        bands.append(w_ref[0, c] * x_up + w_ref[1, c] * x + w_ref[2, c] * x_dn)

    # Combine the 3 bands with only TWO lane shifts, zeros shifted in at the borders.
    zcol = jnp.zeros((Bt, H, 1), jnp.float32)
    left = jnp.concatenate([zcol, bands[0][:, :, : W - 1]], axis=2)   # band_0[i, j-1]
    right = jnp.concatenate([bands[2][:, :, 1:], zcol], axis=2)       # band_2[i, j+1]
    acc = b_ref[0] + bands[1] + left + right

    # MYSELU: y * 1 / (1 + exp(-y)).  exp -> EUP; approx reciprocal -> EUP as well.
    sig = pl.reciprocal(1.0 + jnp.exp(-acc), approx=True)
    o_ref[...] = (acc * sig).astype(o_ref.dtype)


def _pick_batch_tile(B, H, W, target_bytes=1 << 20):
    """Largest divisor of B whose (Bt, H, W) f32 block stays ~under target_bytes."""
    per_plane = H * W * 4
    bt = max(1, min(B, max(1, target_bytes // per_plane)))
    while B % bt:
        bt -= 1
    return bt


def model_forward(x, conv_w, conv_b):
    """x: (B, 1, H, W) float32 NCHW.  Returns (B, 1, H, W)."""
    B, C, H, W = x.shape
    assert C == 1, "Model uses Conv2d(1, 1, 3, padding=1)"
    x3 = x[:, 0, :, :]                                  # (B, H, W): squeeze of size-1 dim, no copy
    w2d = conv_w.reshape(3, 3).astype(jnp.float32)
    b1d = conv_b.reshape(1).astype(jnp.float32)

    Bt = _pick_batch_tile(B, H, W)
    grid = (B // Bt,)

    cost = pl.CostEstimate(
        flops=19 * B * H * W,            # 9 mul + 8 add + bias + silu mul per output element
        transcendentals=B * H * W,       # one exp per output element
        bytes_accessed=2 * 4 * B * H * W,
    )

    out = pl.pallas_call(
        _conv3x3_silu_kernel,
        out_shape=jax.ShapeDtypeStruct((B, H, W), x.dtype),
        grid=grid,
        in_specs=[
            pl.BlockSpec((Bt, H, W), lambda i: (i, 0, 0)),
            pl.BlockSpec(memory_space=pltpu.MemorySpace.SMEM),
            pl.BlockSpec(memory_space=pltpu.MemorySpace.SMEM),
        ],
        out_specs=pl.BlockSpec((Bt, H, W), lambda i: (i, 0, 0)),
        compiler_params=pltpu.CompilerParams(dimension_semantics=("parallel",)),
        cost_estimate=cost,
    )(x3, w2d, b1d)
    return out[:, None, :, :]            # back to NCHW


def _reference(x, conv_w, conv_b):
    # Pure-JAX reference for validation.
    B, C, H, W = x.shape
    xp = jnp.pad(x[:, 0], ((0, 0), (1, 1), (1, 1)))
    w2d = conv_w.reshape(3, 3)
    acc = jnp.zeros((B, H, W), jnp.float32) + conv_b.reshape(())
    for di in range(3):
        for dj in range(3):
            acc = acc + w2d[di, dj] * xp[:, di:di + H, dj:dj + W]
    y = acc * (1.0 / (1.0 + jnp.exp(-acc)))
    return y[:, None]


if __name__ == "__main__":
    key = jax.random.PRNGKey(0)
    B, C, H, W = 2, 1, 16, 16
    x = jax.random.normal(key, (B, C, H, W), dtype=jnp.float32)

    # Deterministic parameter init, matching the module's __init__:
    #   self.conv.weight.data.fill_(1); self.conv.bias.data.fill_(0)
    conv_w = jnp.ones((1, 1, 3, 3), dtype=jnp.float32)
    conv_b = jnp.zeros((1,), dtype=jnp.float32)
    # MYSELU's nn.Parameter (arange(3)) is never used in forward; kept only for fidelity.
    myselu_param = jnp.arange(3, dtype=jnp.float32)  # noqa: F841

    out = jax.block_until_ready(model_forward(x, conv_w, conv_b))
    ref = _reference(x, conv_w, conv_b)

    assert out.shape == (B, C, H, W)
    # approx reciprocal (EUP vrcp) is used for the sigmoid -> slightly looser tolerance.
    err = float(jnp.max(jnp.abs(out - ref)))
    assert jnp.allclose(out, ref, atol=5e-3, rtol=5e-3), f"max abs err = {err}"
    print("KERNEL_OK")
</pallas_src>

<mosaic_0001>
module attributes {stable_mosaic.version = 11 : i64} {
  func.func @_conv3x3_silu_kernel(%arg0: i32, %arg1: memref<2x16x16xf32, #tpu.memory_space<vmem>>, %arg2: memref<3x3xf32, #tpu.memory_space<smem>>, %arg3: memref<1xf32, #tpu.memory_space<smem>>, %arg4: memref<2x16x16xf32, #tpu.memory_space<vmem>>) attributes {dimension_semantics = [#tpu.dimension_semantics<parallel>], iteration_bounds = array<i64: 1>, scalar_prefetch = 0 : i64, scratch_operands = 0 : i64, tpu.core_type = #tpu.core_type<tc>, window_params = [{transform_indices = @transform_0, window_bounds = array<i64: 2, 16, 16>}, {transform_indices = @transform_1, window_bounds = array<i64: 3, 3>}, {transform_indices = @transform_2, window_bounds = array<i64: 1>}, {transform_indices = @transform_3, window_bounds = array<i64: 2, 16, 16>}]} {
    %c0 = arith.constant 0 : index
    %c0_0 = arith.constant 0 : index
    %c0_1 = arith.constant 0 : index
    %0 = vector.load %arg1[%c0, %c0_0, %c0_1] : memref<2x16x16xf32, #tpu.memory_space<vmem>>, vector<2x16x16xf32>
    %cst = arith.constant 0.000000e+00 : f32
    %1 = vector.broadcast %cst : f32 to vector<2x1x16xf32>
    %2 = vector.extract_strided_slice %0 {offsets = [0, 0, 0], sizes = [2, 15, 16], strides = [1, 1, 1]} : vector<2x16x16xf32> to vector<2x15x16xf32>
    %3 = tpu.concatenate %1, %2 in 1 : vector<2x1x16xf32>, vector<2x15x16xf32> -> vector<2x16x16xf32>
    %4 = vector.extract_strided_slice %0 {offsets = [0, 1, 0], sizes = [2, 15, 16], strides = [1, 1, 1]} : vector<2x16x16xf32> to vector<2x15x16xf32>
    %5 = tpu.concatenate %4, %1 in 1 : vector<2x15x16xf32>, vector<2x1x16xf32> -> vector<2x16x16xf32>
    %c0_2 = arith.constant 0 : index
    %c0_3 = arith.constant 0 : index
    %6 = memref.load %arg2[%c0_2, %c0_3] : memref<3x3xf32, #tpu.memory_space<smem>>
    %7 = vector.broadcast %6 : f32 to vector<2x16x16xf32>
    %8 = arith.mulf %7, %3 : vector<2x16x16xf32>
    %c1 = arith.constant 1 : index
    %c0_4 = arith.constant 0 : index
    %9 = memref.load %arg2[%c1, %c0_4] : memref<3x3xf32, #tpu.memory_space<smem>>
    %10 = vector.broadcast %9 : f32 to vector<2x16x16xf32>
    %11 = arith.mulf %10, %0 : vector<2x16x16xf32>
    %12 = arith.addf %8, %11 : vector<2x16x16xf32>
    %c2 = arith.constant 2 : index
    %c0_5 = arith.constant 0 : index
    %13 = memref.load %arg2[%c2, %c0_5] : memref<3x3xf32, #tpu.memory_space<smem>>
    %14 = vector.broadcast %13 : f32 to vector<2x16x16xf32>
    %15 = arith.mulf %14, %5 : vector<2x16x16xf32>
    %16 = arith.addf %12, %15 : vector<2x16x16xf32>
    %c0_6 = arith.constant 0 : index
    %c1_7 = arith.constant 1 : index
    %17 = memref.load %arg2[%c0_6, %c1_7] : memref<3x3xf32, #tpu.memory_space<smem>>
    %18 = vector.broadcast %17 : f32 to vector<2x16x16xf32>
    %19 = arith.mulf %18, %3 : vector<2x16x16xf32>
    %c1_8 = arith.constant 1 : index
    %c1_9 = arith.constant 1 : index
    %20 = memref.load %arg2[%c1_8, %c1_9] : memref<3x3xf32, #tpu.memory_space<smem>>
    %21 = vector.broadcast %20 : f32 to vector<2x16x16xf32>
    %22 = arith.mulf %21, %0 : vector<2x16x16xf32>
    %23 = arith.addf %19, %22 : vector<2x16x16xf32>
    %c2_10 = arith.constant 2 : index
    %c1_11 = arith.constant 1 : index
    %24 = memref.load %arg2[%c2_10, %c1_11] : memref<3x3xf32, #tpu.memory_space<smem>>
    %25 = vector.broadcast %24 : f32 to vector<2x16x16xf32>
    %26 = arith.mulf %25, %5 : vector<2x16x16xf32>
    %27 = arith.addf %23, %26 : vector<2x16x16xf32>
    %c0_12 = arith.constant 0 : index
    %c2_13 = arith.constant 2 : index
    %28 = memref.load %arg2[%c0_12, %c2_13] : memref<3x3xf32, #tpu.memory_space<smem>>
    %29 = vector.broadcast %28 : f32 to vector<2x16x16xf32>
    %30 = arith.mulf %29, %3 : vector<2x16x16xf32>
    %c1_14 = arith.constant 1 : index
    %c2_15 = arith.constant 2 : index
    %31 = memref.load %arg2[%c1_14, %c2_15] : memref<3x3xf32, #tpu.memory_space<smem>>
    %32 = vector.broadcast %31 : f32 to vector<2x16x16xf32>
    %33 = arith.mulf %32, %0 : vector<2x16x16xf32>
    %34 = arith.addf %30, %33 : vector<2x16x16xf32>
    %c2_16 = arith.constant 2 : index
    %c2_17 = arith.constant 2 : index
    %35 = memref.load %arg2[%c2_16, %c2_17] : memref<3x3xf32, #tpu.memory_space<smem>>
    %36 = vector.broadcast %35 : f32 to vector<2x16x16xf32>
    %37 = arith.mulf %36, %5 : vector<2x16x16xf32>
    %38 = arith.addf %34, %37 : vector<2x16x16xf32>
    %cst_18 = arith.constant 0.000000e+00 : f32
    %39 = vector.broadcast %cst_18 : f32 to vector<2x16x1xf32>
    %40 = vector.extract_strided_slice %16 {offsets = [0, 0, 0], sizes = [2, 16, 15], strides = [1, 1, 1]} : vector<2x16x16xf32> to vector<2x16x15xf32>
    %41 = tpu.concatenate %39, %40 in 2 : vector<2x16x1xf32>, vector<2x16x15xf32> -> vector<2x16x16xf32>
    %42 = vector.extract_strided_slice %38 {offsets = [0, 0, 1], sizes = [2, 16, 15], strides = [1, 1, 1]} : vector<2x16x16xf32> to vector<2x16x15xf32>
    %43 = tpu.concatenate %42, %39 in 2 : vector<2x16x15xf32>, vector<2x16x1xf32> -> vector<2x16x16xf32>
    %c0_19 = arith.constant 0 : index
    %44 = memref.load %arg3[%c0_19] : memref<1xf32, #tpu.memory_space<smem>>
    %45 = vector.broadcast %44 : f32 to vector<2x16x16xf32>
    %46 = arith.addf %45, %27 : vector<2x16x16xf32>
    %47 = arith.addf %46, %41 : vector<2x16x16xf32>
    %48 = arith.addf %47, %43 : vector<2x16x16xf32>
    %cst_20 = arith.constant 0.000000e+00 : f32
    %49 = vector.broadcast %cst_20 : f32 to vector<2x16x16xf32>
    %50 = arith.subf %49, %48 : vector<2x16x16xf32>
    %51 = math.exp %50 : vector<2x16x16xf32>
    %cst_21 = arith.constant 1.000000e+00 : f32
    %52 = vector.broadcast %cst_21 : f32 to vector<2x16x16xf32>
    %53 = arith.addf %52, %51 : vector<2x16x16xf32>
    %54 = tpu.reciprocal %53 {approx = true} : vector<2x16x16xf32> -> vector<2x16x16xf32>
    %55 = arith.mulf %48, %54 : vector<2x16x16xf32>
    %c0_22 = arith.constant 0 : index
    %c0_23 = arith.constant 0 : index
    %c0_24 = arith.constant 0 : index
    %56 = vector.load %arg4[%c0_22, %c0_23, %c0_24] : memref<2x16x16xf32, #tpu.memory_space<vmem>>, vector<2x16x16xf32>
    tpu.vector_store %arg4[%c0_22, %c0_23, %c0_24], %55 {strides = array<i32>} : memref<2x16x16xf32, #tpu.memory_space<vmem>>, vector<2x16x16xf32>,
    return
  }
  func.func @transform_0(%arg0: i32) -> (i32, i32, i32) {
    %c0_i32 = arith.constant 0 : i32
    %c0_i32_0 = arith.constant 0 : i32
    %c0_i32_1 = arith.constant 0 : i32
    return %arg0, %c0_i32, %c0_i32_0 : i32, i32, i32
  }
  func.func @transform_1(%arg0: i32) -> (i32, i32) {
    %c0_i32 = arith.constant 0 : i32
    %c0_i32_0 = arith.constant 0 : i32
    %c0_i32_1 = arith.constant 0 : i32
    return %c0_i32, %c0_i32_0 : i32, i32
  }
  func.func @transform_2(%arg0: i32) -> i32 {
    %c0_i32 = arith.constant 0 : i32
    %c0_i32_0 = arith.constant 0 : i32
    return %c0_i32 : i32
  }
  func.func @transform_3(%arg0: i32) -> (i32, i32, i32) {
    %c0_i32 = arith.constant 0 : i32
    %c0_i32_0 = arith.constant 0 : i32
    %c0_i32_1 = arith.constant 0 : i32
    return %arg0, %c0_i32, %c0_i32_0 : i32, i32, i32
  }
}

</mosaic_0001>

<bundles_post_ra>
// kernel: tpu_custom_call.1
= control target key start
LH: loop header
LB: loop body
LE: loop exit
PB: predicated region body
PF: predicated region fallthrough
CT: control target
= control target key end

     0   :  { %9 = vsyncpa [#allocation4], 0  ;;  %s476_s0 = inlined_call_operand.hbm [shape: f32[2,16,16], index: 0, kind: input, shape index: {}]   ;;  %s477_s1 = inlined_call_operand.hbm [shape: f32[3,3], index: 1, kind: input, shape index: {}]   ;;  %s478_s2 = inlined_call_operand.<no memory space> [shape: f32[1], index: 2, kind: input, shape index: {}]   ;;  %s479_s3 = inlined_call_operand.hbm [shape: f32[2,16,16], index: 3, kind: output, shape index: {}]  }
   0x1   :  { %10 = vsyncpa [#allocation6], 0 }
   0x2   :  { %11 = vsyncpa [#allocation5], 0  ;;  %s341_s12 = smov [#allocation3]  }
   0x3   :  { %s17_s13 = sshll.u32 %s341_s12, 4  ;;  %s18_s13 = int_to_ptr.vmem [resolvable:$true] %s17_s13 }
   0x4   :  { %s295_s14 = scalar_lea.vmem %s18_s13, 512  ;;  %p300_p1 = scmp.lt.s32.totalorder %s18_s13, %s18_s13 }
   0x5   :  { %p296_p0 = scmp.ne.s32.totalorder %s18_s13, %s295_s14  ;;  %p301_p2 = scmp.lt.s32.totalorder %s295_s14, %s295_s14 }
   0x7   :  { %p302_p3 = por %p301_p2, %p300_p1 }
   0x9   :  { %p303_p4 = pnand %p302_p3, %p296_p0 }
   0xb   :  { %306 = shalt.err (!%p303_p4)
}
   0xc   :  { %s342_s15 = smov 128   ;;  %s343_s16 = smov 8  }
   0xd   :  { %23 = dma.hbm_to_vmem [thread:$0]  %s476_s0, 512, %s18_s13, [#allocation4], %s342_s15, %s342_s15, %s343_s16  }
   0xe   :  { %s344_s19 = smov [#allocation7]  }
   0xf   :  { %31 = dma.hbm_to_smem %s477_s1, 64, %s344_s19, [#allocation6]  }
  0x10   :  { %335 = dma.done.wait [#allocation4], 512  }
  0x11   :  { %336 = vsyncadd [#allocation4], 4294966784 }
  0x12   :  { %337 = dma.done.wait [#allocation6], 64  }
  0x13   :  { %338 = vsyncadd [#allocation6], 4294967232 }
  0x14   :  { %40 = sfence }
  0x15   :  { %v377_v0 = vld [vmem:[#allocation3 + $0x10] sm:$0xff]  ;;  %v379_v1 = vld [vmem:[#allocation3 + $0x18] sm:$0xff]  ;;  %s75_s22 = sld [smem:[#allocation7]]  ;;  %vm49_vm0 = vcmask 1040384   ;;  %vm62_vm1 = vcmask 1046528   ;;  %v384_v5 = vld [vmem:[#allocation3] sm:$0xff] }
  0x16   :  { %v53_v2 = vrot.slane %v377_v0, 7  ;;  %v66_v3 = vrot.slane %v377_v0, 1  ;;  %v67_v4 = vrot.slane %v379_v1, 1  ;;  %s256_s0 = sld [smem:[#allocation7 + $0x80]]  ;;  %v386_v6 = vld [vmem:[#allocation3 + $0x8] sm:$0xff]  ;;  %v54_v7 = vrot.slane %v379_v1, 7 }
  0x17   :  { %s257_s1 = sld [smem:[#allocation7 + $0x100]]  ;;  %v50_v8 = vrot.slane %v384_v5, 7  ;;  %v63_v9 = vrot.slane %v384_v5, 1  ;;  %v64_v11 = vrot.slane %v386_v6, 1  ;;  %v51_v13 = vrot.slane %v386_v6, 7  ;;  %s345_s29 = smov 1  }
  0x18   :  { %s391_s23 = sld [smem:[#allocation7 + $0x2]]  ;;  %v61_v10 = vsel %vm49_vm0, 0.0, %v53_v2  ;;  %v396_v12 = vsel %vm49_vm0, %v53_v2, %v54_v7  ;;  %v402_v14 = vsel %vm62_vm1, %v66_v3, %v67_v4  ;;  %v408_v16 = vsel %vm62_vm1, %v67_v4, 0.0  ;;  %s346_s30 = smov 127  }
  0x19   :  { %s399_s24 = sld [smem:[#allocation7 + $0x82]]  ;;  %v405_v15 = vsel %vm49_vm0, 0.0, %v50_v8  ;;  %v411_v18 = vsel %vm62_vm1, %v63_v9, %v64_v11  ;;  %v414_v19 = vsel %vm49_vm0, %v50_v8, %v51_v13  ;;  %v417_v20 = vsel %vm62_vm1, %v64_v11, 0.0 }
  0x1a   :  { %s263_s25 = sld [smem:[#allocation7 + $0x102]]  ;;  %vm169_vm2 = vcmask 7168   ;;  %vm190_vm3 = vcmask 121856   ;;  %vm233_vm4 = vcmask 130048  }
  0x1b   :  { %v76_v17 = vstv %s75_s22  ;;  %s419_s26 = sld [smem:[#allocation7 + $0x1]] }
  0x1c   :  { %v79_v21 = vmul.f32 %v76_v17, %v61_v10  ;;  %v82_v22 = vstv %s256_s0  ;;  %v77_v23 = vmul.f32 %v76_v17, %v405_v15  ;;  %v80_v24 = vmul.f32 %v76_v17, %v396_v12  ;;  %s430_s27 = sld [smem:[#allocation7 + $0x81]] }
  0x1d   :  { %v85_v25 = vmul.f32 %v82_v22, %v377_v0  ;;  %v92_v26 = vstv %s257_s1  ;;  %v83_v27 = vmul.f32 %v82_v22, %v384_v5  ;;  %v86_v28 = vmul.f32 %v82_v22, %v379_v1  ;;  %s433_s28 = sld [smem:[#allocation7 + $0x101]] }
  0x1e   :  { %v95_v29 = vmul.f32 %v92_v26, %v402_v14  ;;  %v93_v30 = vmul.f32 %v92_v26, %v411_v18  ;;  %v96_v31 = vmul.f32 %v92_v26, %v408_v16  ;;  %v78_v32 = vmul.f32 %v76_v17, %v414_v19 }
  0x1f   :  { %v89_v33 = vadd.f32 %v85_v25, %v79_v21  ;;  %v87_v34 = vadd.f32 %v83_v27, %v77_v23  ;;  %v90_v35 = vadd.f32 %v86_v28, %v80_v24  ;;  %v84_v36 = vmul.f32 %v82_v22, %v386_v6 }
  0x20   :  { %v94_v37 = vmul.f32 %v92_v26, %v417_v20  ;;  %v128_v38 = vstv %s391_s23  ;;  %v134_v39 = vstv %s399_s24  ;;  %v144_v40 = vstv %s263_s25 }
  0x21   :  { %v99_v41 = vadd.f32 %v95_v29, %v89_v33  ;;  %v97_v42 = vadd.f32 %v93_v30, %v87_v34  ;;  %v100_v43 = vadd.f32 %v96_v31, %v90_v35  ;;  %v88_v44 = vadd.f32 %v84_v36, %v78_v32 }
  0x22   :  { %v130_v45 = vmul.f32 %v128_v38, %v414_v19  ;;  %v136_v46 = vmul.f32 %v134_v39, %v386_v6  ;;  %v146_v47 = vmul.f32 %v144_v40, %v417_v20  ;;  %v129_v48 = vmul.f32 %v128_v38, %v405_v15 }
  0x23   :  { %161 = vrot.lane.b32.xlu1 %v99_v41, %s345_s29  ;;  %157 = vrot.lane.b32.xlu0 %v97_v42, %s345_s29  ;;  %v98_v49 = vadd.f32 %v94_v37, %v88_v44  ;;  %v135_v50 = vmul.f32 %v134_v39, %v384_v5  ;;  %v145_v51 = vmul.f32 %v144_v40, %v411_v18  ;;  %v102_v52 = vstv %s419_s26 }
  0x24   :  { %v140_v53 = vadd.f32 %v136_v46, %v130_v45  ;;  %v132_v54 = vmul.f32 %v128_v38, %v396_v12  ;;  %v138_v55 = vmul.f32 %v134_v39, %v379_v1  ;;  %v148_v56 = vmul.f32 %v144_v40, %v408_v16 }
  0x25   :  { %v139_v57 = vadd.f32 %v135_v50, %v129_v48  ;;  %v131_v58 = vmul.f32 %v128_v38, %v61_v10  ;;  %v137_v59 = vmul.f32 %v134_v39, %v377_v0  ;;  %v147_v60 = vmul.f32 %v144_v40, %v402_v14 }
  0x26   :  { %v150_v61 = vadd.f32 %v146_v47, %v140_v53  ;;  %v142_v62 = vadd.f32 %v138_v55, %v132_v54  ;;  %v105_v63 = vmul.f32 %v102_v52, %v61_v10  ;;  %v108_v2 = vstv %s430_s27 }
  0x27   :  { %163 = vrot.lane.b32.xlu1 %v100_v43, %s345_s29  ;;  %159 = vrot.lane.b32.xlu0 %v98_v49, %s345_s29  ;;  %v149_v3 = vadd.f32 %v145_v51, %v139_v57  ;;  %v141_v4 = vadd.f32 %v137_v59, %v131_v58  ;;  %v111_v7 = vmul.f32 %v108_v2, %v377_v0  ;;  %v118_v8 = vstv %s433_s28 }
  0x28   :  { %v152_v9 = vadd.f32 %v148_v56, %v142_v62  ;;  %v121_v11 = vmul.f32 %v118_v8, %v402_v14  ;;  %v103_v13 = vmul.f32 %v102_v52, %v405_v15  ;;  %v109_v17 = vmul.f32 %v108_v2, %v384_v5 }
  0x29   :  { %v151_v21 = vadd.f32 %v147_v60, %v141_v4  ;;  %v115_v22 = vadd.f32 %v111_v7, %v105_v63  ;;  %v119_v23 = vmul.f32 %v118_v8, %v411_v18  ;;  %v106_v10 = vmul.f32 %v102_v52, %v396_v12 }
  0x2a   :  { %v113_v24 = vadd.f32 %v109_v17, %v103_v13  ;;  %v112_v25 = vmul.f32 %v108_v2, %v379_v1  ;;  %v122_v26 = vmul.f32 %v118_v8, %v408_v16  ;;  %v104_v0 = vmul.f32 %v102_v52, %v414_v19 }
  0x2b   :  { %180 = vrot.lane.b32.xlu1 %v150_v61, %s346_s30  ;;  %178 = vrot.lane.b32.xlu0 %v149_v3, %s346_s30  ;;  %v125_v14 = vadd.f32 %v121_v11, %v115_v22  ;;  %v110_v15 = vmul.f32 %v108_v2, %v386_v6  ;;  %v120_v5 = vmul.f32 %v118_v8, %v417_v20  ;;  %v196_v16 = vstv %s478_s2  ;;  %s347_s2 = smov [#allocation8]  }
  0x2c   :  { %v123_v27 = vadd.f32 %v119_v23, %v113_v24  ;;  %v116_v28 = vadd.f32 %v112_v25, %v106_v10  ;;  %s243_s6 = sshll.u32 %s347_s2, 4  ;;  %s244_s6 = int_to_ptr.vmem [resolvable:$true] %s243_s6 }
  0x2d   :  { %v114_v18 = vadd.f32 %v110_v15, %v104_v0  ;;  %v199_v34 = vadd.f32 %v196_v16, %v125_v14  ;;  %s315_s7 = scalar_lea.vmem %s244_s6, 512  ;;  %p320_p6 = scmp.lt.s32.totalorder %s244_s6, %s244_s6 }
  0x2e   :  { %v126_v29 = vadd.f32 %v122_v26, %v116_v28  ;;  %v197_v19 = vadd.f32 %v196_v16, %v123_v27  ;;  %p316_p5 = scmp.ne.s32.totalorder %s244_s6, %s315_s7  ;;  %p321_p7 = scmp.lt.s32.totalorder %s315_s7, %s315_s7 }
  0x2f   :  { %184 = vrot.lane.b32.xlu1 %v152_v9, %s346_s30  ;;  %182 = vrot.lane.b32.xlu0 %v151_v21, %s346_s30  ;;  %v124_v12 = vadd.f32 %v120_v5, %v114_v18 }
  0x30   :  { %v200_v36 = vadd.f32 %v196_v16, %v126_v29  ;;  %p322_p8 = por %p321_p7, %p320_p6 }
  0x31   :  { %v198_v32 = vadd.f32 %v196_v16, %v124_v12 }
  0x32   :  { %p323_p9 = pnand %p322_p8, %p316_p5 }
  0x95   :  { %v162_v1 = vpop.permute.xlu1 %161  ;;  %v158_v30 = vpop.permute.xlu0 %157 }
  0x96   :  { %v170_v33 = vsel %vm169_vm2, 0.0, %v158_v30  ;;  %v172_v40 = vsel %vm169_vm2, 0.0, %v162_v1 }
  0x97   :  { %v201_v35 = vadd.f32 %v197_v19, %v170_v33  ;;  %v203_v46 = vadd.f32 %v199_v34, %v172_v40 }
  0x99   :  { %v164_v31 = vpop.permute.xlu1 %163  ;;  %v160_v6 = vpop.permute.xlu0 %159 }
  0x9a   :  { %v171_v20 = vsel %vm169_vm2, 0.0, %v160_v6  ;;  %v173_v41 = vsel %vm169_vm2, 0.0, %v164_v31 }
  0x9b   :  { %v202_v37 = vadd.f32 %v198_v32, %v171_v20  ;;  %v204_v47 = vadd.f32 %v200_v36, %v173_v41 }
  0x9d   :  { %v181_v38 = vpop.permute.xlu1 %180  ;;  %v179_v39 = vpop.permute.xlu0 %178 }
  0x9e   :  { %v192_v42 = vsel %vm190_vm3, %v181_v38, 0.0  ;;  %v191_v43 = vsel %vm190_vm3, %v179_v39, 0.0 }
  0x9f   :  { %v206_v44 = vadd.f32 %v202_v37, %v192_v42  ;;  %v205_v45 = vadd.f32 %v201_v35, %v191_v43 }
  0xa1   :  { %v210_v48 = vsub.f32 0.0, %v206_v44  ;;  %v209_v49 = vsub.f32 0.0, %v205_v45  ;;  %v185_v50 = vpop.permute.xlu1 %184  ;;  %v183_v51 = vpop.permute.xlu0 %182 }
  0xa2   :  { %v194_v52 = vsel %vm190_vm3, %v185_v50, 0.0  ;;  %v193_v53 = vsel %vm190_vm3, %v183_v51, 0.0 }
  0xa3   :  { %v215_v54 = vmul.f32 1.442695, %v210_v48  ;;  %v213_v55 = vmul.f32 1.442695, %v209_v49  ;;  %v208_v56 = vadd.f32 %v204_v47, %v194_v52  ;;  %v207_v57 = vadd.f32 %v203_v46, %v193_v53 }
  0xa5   :  { %271 = vpow2.f32 %v215_v54  ;;  %v212_v58 = vsub.f32 0.0, %v208_v56  ;;  %v211_v59 = vsub.f32 0.0, %v207_v57 }
  0xa6   :  { %273 = vpow2.f32 %v213_v55 }
  0xa7   :  { %v219_v60 = vmul.f32 1.442695, %v212_v58  ;;  %v217_v61 = vmul.f32 1.442695, %v211_v59 }
  0xa9   :  { %275 = vpow2.f32 %v219_v60 }
  0xaa   :  { %277 = vpow2.f32 %v217_v61 }
  0xb2   :  { %v272_v62 = vpop.eup %271 }
  0xb3   :  { %v274_v63 = vpop.eup %273  ;;  %v222_v2 = vadd.f32 1.0, %v272_v62 }
  0xb4   :  { %v221_v3 = vadd.f32 1.0, %v274_v63 }
  0xb5   :  { %279 = vrcp.f32 %v222_v2 }
  0xb6   :  { %v276_v4 = vpop.eup %275  ;;  %281 = vrcp.f32 %v221_v3 }
  0xb7   :  { %v278_v7 = vpop.eup %277  ;;  %v224_v8 = vadd.f32 1.0, %v276_v4 }
  0xb8   :  { %v223_v9 = vadd.f32 1.0, %v278_v7 }
  0xb9   :  { %283 = vrcp.f32 %v224_v8 }
  0xba   :  { %285 = vrcp.f32 %v223_v9 }
  0xc2   :  { %v280_v11 = vpop.eup %279 }
  0xc3   :  { %v282_v13 = vpop.eup %281  ;;  %v230_v17 = vmul.f32 %v280_v11, %v206_v44 }
  0xc4   :  { %v229_v21 = vmul.f32 %v282_v13, %v205_v45 }
  0xc5   :  { %235 = vst.msk [vmem:[#allocation8 + $0x8] sm:$0xff] %vm233_vm4, %v230_v17 }
  0xc6   :  { %v284_v22 = vpop.eup %283  ;;  %234 = vst.msk [vmem:[#allocation8] sm:$0xff] %vm233_vm4, %v229_v21 }
  0xc7   :  { %v286_v23 = vpop.eup %285  ;;  %v232_v10 = vmul.f32 %v284_v22, %v208_v56 }
  0xc8   :  { %v231_v24 = vmul.f32 %v286_v23, %v207_v57 }
  0xc9   :  { %237 = vst.msk [vmem:[#allocation8 + $0x18] sm:$0xff] %vm233_vm4, %v232_v10 }
  0xca   :  { %236 = vst.msk [vmem:[#allocation8 + $0x10] sm:$0xff] %vm233_vm4, %v231_v24 }
  0xcb   :  { %326 = shalt.err (!%p323_p9)
}
  0xcc   :  { %249 = dma.vmem_to_hbm [thread:$0]  %s244_s6, 512, %s479_s3, [#allocation5], %s342_s15, %s342_s15, %s343_s16  }
  0xcd   :  { %339 = dma.done.wait [#allocation5], 512  }
  0xce   :  { %340 = vsyncadd [#allocation5], 4294966784 }
  0xcf   :  { %253 = vsyncpa [#allocation4], 1 }
  0xd0   :  { %254 = vsyncpa [#allocation5], 1 }
  0xd1   :  { %255 = vsyncpa [#allocation6], 1 }

</bundles_post_ra>
